<compile_context>
chip_gen: v6e
topology: v6e:2x2x1
jax: 0.10.0
libtpu: 0.0.40
codegen_flags: <defaults>
</compile_context>

<pallas_src>
import jax
import jax.numpy as jnp
from jax.experimental import pallas as pl
from jax.experimental.pallas import tpu as pltpu

_TARGET_TILE_BYTES = 4 * 1024 * 1024        # ~4 MiB per tile
_VMEM_LIMIT_BYTES = 32 * 1024 * 1024        # explicit scoped-VMEM budget (safe on v5e/v6e/v7x)
_SINGLE_BLOCK_VMEM_BYTES = 4 * 1024 * 1024  # ragged arrays up to this (padded) size: one block


def _lambda_kernel(x_ref, o_ref):
    # fun(x) = x * 2 + 1, computed in the native input dtype (weak python
    # scalars avoid hidden up/down casts).
    x = x_ref[...]
    o_ref[...] = x * 2 + 1


def _round_up(a: int, b: int) -> int:
    return -(-a // b) * b


def _sublane_quantum(dtype) -> int:
    # f32 -> 8, bf16/f16 -> 16, int8/fp8 -> 32 (sub-32-bit dtypes pack sublanes).
    itemsize = jnp.dtype(dtype).itemsize
    return max(8, 32 // max(1, itemsize))


def _padded_vmem_bytes(rows: int, cols: int, dtype) -> int:
    # Estimate of the VMEM footprint of a (rows, cols) block after tiling pad.
    q = _sublane_quantum(dtype)
    return _round_up(rows, q) * _round_up(cols, 128) * jnp.dtype(dtype).itemsize


def _tiled_elementwise(x2d: jax.Array) -> jax.Array:
    """Row-tiled, auto-pipelined elementwise pass over a lane-dense 2-D slab."""
    rows, cols = x2d.shape
    dtype = x2d.dtype
    itemsize = jnp.dtype(dtype).itemsize
    q = _sublane_quantum(dtype)

    # Byte-budgeted tile height, rounded down to the sublane quantum.
    tile_rows = max(q, (_TARGET_TILE_BYTES // (cols * itemsize)) // q * q)
    if rows <= tile_rows:
        if rows >= 2 * q:
            # Whole array would fit in one tile: split into >=2 programs so the
            # "parallel" axis can be sharded across v7x's two TensorCores.
            tile_rows = _round_up(pl.cdiv(rows, 2), q)
        else:
            tile_rows = rows  # full-extent block (rows may be < sublane quantum)
    grid = (pl.cdiv(rows, tile_rows),)  # ragged last block is masked by Pallas

    return pl.pallas_call(
        _lambda_kernel,
        out_shape=jax.ShapeDtypeStruct((rows, cols), dtype),
        grid=grid,
        in_specs=[pl.BlockSpec((tile_rows, cols), lambda i: (i, 0))],
        out_specs=pl.BlockSpec((tile_rows, cols), lambda i: (i, 0)),
        compiler_params=pltpu.CompilerParams(
            dimension_semantics=("parallel",),
            vmem_limit_bytes=_VMEM_LIMIT_BYTES,
        ),
    )(x2d)


def _single_block_elementwise(x2d: jax.Array) -> jax.Array:
    """One full-extent VMEM block (small / ragged arrays; no pad or slice)."""
    rows, cols = x2d.shape
    return pl.pallas_call(
        _lambda_kernel,
        out_shape=jax.ShapeDtypeStruct((rows, cols), x2d.dtype),
        grid=(1,),
        in_specs=[pl.BlockSpec((rows, cols), lambda i: (0, 0))],
        out_specs=pl.BlockSpec((rows, cols), lambda i: (0, 0)),
        compiler_params=pltpu.CompilerParams(
            dimension_semantics=("arbitrary",),
            vmem_limit_bytes=_VMEM_LIMIT_BYTES,
        ),
    )(x2d)


def lambda_module_forward(x: jax.Array) -> jax.Array:
    """LambdaModule.forward with fun(x) = 2*x + 1, elementwise, native dtype."""
    orig_shape = x.shape
    dtype = x.dtype
    n = int(x.size)
    if n == 0:
        return x

    # Common case: flat size is a multiple of 128 -> a lane-dense 2-D view is a
    # free layout-preserving reshape; no pad / slice HBM passes at all.
    cols = next((c for c in (512, 256, 128) if n % c == 0), None)
    if cols is not None:
        out2d = _tiled_elementwise(x.reshape(n // cols, cols))
        return out2d.reshape(orig_shape)

    # Ragged flat size: small arrays run as a single full-extent block using a
    # free 2-D view (natural collapse or flat row), still with no pad / slice.
    last = orig_shape[-1] if len(orig_shape) >= 1 else 1
    candidates = [(max(1, n // max(1, last)), max(1, last)), (1, n)]
    candidates.sort(key=lambda rc: _padded_vmem_bytes(rc[0], rc[1], dtype))
    r, c = candidates[0]
    if _padded_vmem_bytes(r, c, dtype) <= _SINGLE_BLOCK_VMEM_BYTES:
        out2d = _single_block_elementwise(x.reshape(r, c))
        return out2d.reshape(orig_shape)

    # TODO(synk): large arrays whose flat size is not a multiple of 128 still
    # pay a pad + slice round trip (two extra HBM passes); handle the tail
    # in-kernel (BoundedSlice / masked store) if this path ever matters in CRN.
    pad = (-n) % 128
    flat = jnp.pad(x.reshape(-1), (0, pad))
    out2d = _tiled_elementwise(flat.reshape((n + pad) // 128, 128))
    return out2d.reshape(-1)[:n].reshape(orig_shape)


if __name__ == "__main__":
    key = jax.random.PRNGKey(0)

    # Small NCHW input consistent with a CRN feature map: batch=2, C=4, 16x16.
    x = jax.random.normal(key, (2, 4, 16, 16), dtype=jnp.float32)
    y = jax.block_until_ready(lambda_module_forward(x))
    ref = x * 2 + 1
    assert y.shape == x.shape and y.dtype == x.dtype
    assert jnp.allclose(y, ref, atol=1e-6, rtol=1e-6)

    # Ragged total size (exercises the single-full-block, no-pad path).
    x2 = jax.random.normal(jax.random.PRNGKey(1), (3, 5, 7, 9), dtype=jnp.float32)
    y2 = jax.block_until_ready(lambda_module_forward(x2))
    ref2 = x2 * 2 + 1
    assert y2.shape == x2.shape and jnp.allclose(y2, ref2, atol=1e-6, rtol=1e-6)

    # Native-dtype path (bf16): no wrapper casts, computed in bf16.
    x3 = jax.random.normal(jax.random.PRNGKey(2), (2, 4, 16, 16)).astype(jnp.bfloat16)
    y3 = jax.block_until_ready(lambda_module_forward(x3))
    ref3 = x3 * 2 + 1
    assert y3.dtype == jnp.bfloat16 and jnp.allclose(
        y3.astype(jnp.float32), ref3.astype(jnp.float32), atol=1e-2, rtol=1e-2
    )

    print("KERNEL_OK")
</pallas_src>

<mosaic_0001>
module attributes {stable_mosaic.version = 11 : i64} {
  func.func @_lambda_kernel(%arg0: i32, %arg1: memref<4x512xf32, #tpu.memory_space<vmem>>, %arg2: memref<4x512xf32, #tpu.memory_space<vmem>>) attributes {dimension_semantics = [#tpu.dimension_semantics<parallel>], iteration_bounds = array<i64: 1>, scalar_prefetch = 0 : i64, scratch_operands = 0 : i64, tpu.core_type = #tpu.core_type<tc>, window_params = [{transform_indices = @transform_0, window_bounds = array<i64: 4, 512>}, {transform_indices = @transform_1, window_bounds = array<i64: 4, 512>}]} {
    %c0 = arith.constant 0 : index
    %c0_0 = arith.constant 0 : index
    %0 = vector.load %arg1[%c0, %c0_0] : memref<4x512xf32, #tpu.memory_space<vmem>>, vector<4x512xf32>
    %cst = arith.constant 2.000000e+00 : f32
    %1 = vector.broadcast %cst : f32 to vector<4x512xf32>
    %2 = arith.mulf %0, %1 : vector<4x512xf32>
    %cst_1 = arith.constant 1.000000e+00 : f32
    %3 = vector.broadcast %cst_1 : f32 to vector<4x512xf32>
    %4 = arith.addf %2, %3 : vector<4x512xf32>
    %c0_2 = arith.constant 0 : index
    %c0_3 = arith.constant 0 : index
    %5 = vector.load %arg2[%c0_2, %c0_3] : memref<4x512xf32, #tpu.memory_space<vmem>>, vector<4x512xf32>
    tpu.vector_store %arg2[%c0_2, %c0_3], %4 {strides = array<i32>} : memref<4x512xf32, #tpu.memory_space<vmem>>, vector<4x512xf32>,
    return
  }
  func.func @transform_0(%arg0: i32) -> (i32, i32) {
    %c0_i32 = arith.constant 0 : i32
    %c0_i32_0 = arith.constant 0 : i32
    return %arg0, %c0_i32 : i32, i32
  }
  func.func @transform_1(%arg0: i32) -> (i32, i32) {
    %c0_i32 = arith.constant 0 : i32
    %c0_i32_0 = arith.constant 0 : i32
    return %arg0, %c0_i32 : i32, i32
  }
}

</mosaic_0001>

<bundles_post_ra>
// kernel: tpu_custom_call.1
= control target key start
LH: loop header
LB: loop body
LE: loop exit
PB: predicated region body
PF: predicated region fallthrough
CT: control target
= control target key end

     0   :  { %6 = vsyncpa [#allocation3], 0  ;;  %s108_s0 = inlined_call_operand.hbm [shape: f32[4,512], index: 0, kind: input, shape index: {}]   ;;  %s109_s1 = inlined_call_operand.hbm [shape: f32[4,512], index: 1, kind: output, shape index: {}]  }
   0x1   :  { %7 = vsyncpa [#allocation4], 0  ;;  %s90_s6 = smov [#allocation2]  }
   0x2   :  { %s14_s7 = sshll.u32 %s90_s6, 4  ;;  %s15_s7 = int_to_ptr.vmem [resolvable:$true] %s14_s7 }
   0x3   :  { %s54_s8 = scalar_lea.vmem %s15_s7, 256  ;;  %p59_p1 = scmp.lt.s32.totalorder %s15_s7, %s15_s7 }
   0x4   :  { %p55_p0 = scmp.ne.s32.totalorder %s15_s7, %s54_s8  ;;  %p60_p2 = scmp.lt.s32.totalorder %s54_s8, %s54_s8 }
   0x6   :  { %p61_p3 = por %p60_p2, %p59_p1 }
   0x8   :  { %p62_p4 = pnand %p61_p3, %p55_p0 }
   0xa   :  { %65 = shalt.err (!%p62_p4)
}
   0xb   :  { %17 = dma.hbm_to_vmem [thread:$0]  %s108_s0, 256, %s15_s7, [#allocation3]  }
   0xc   :  { %86 = dma.done.wait [#allocation3], 256  }
   0xd   :  { %87 = vsyncadd [#allocation3], 4294967040  ;;  %v21_v0 = vld [vmem:[#allocation2] sm:$0xff]  ;;  %v22_v1 = vld [vmem:[#allocation2 + $0x8] sm:$0xff]  ;;  %s91_s11 = smov [#allocation5]  }
   0xe   :  { %s35_s12 = sshll.u32 %s91_s11, 4  ;;  %v23_v2 = vmul.f32 2.0, %v21_v0  ;;  %v24_v3 = vmul.f32 2.0, %v22_v1  ;;  %s36_s12 = int_to_ptr.vmem [resolvable:$true] %s35_s12 }
   0xf   :  { %s66_s13 = scalar_lea.vmem %s36_s12, 256  ;;  %p71_p6 = scmp.lt.s32.totalorder %s36_s12, %s36_s12 }
  0x10   :  { %v25_v4 = vadd.f32 1.0, %v23_v2  ;;  %v26_v5 = vadd.f32 1.0, %v24_v3  ;;  %p67_p5 = scmp.ne.s32.totalorder %s36_s12, %s66_s13  ;;  %p72_p7 = scmp.lt.s32.totalorder %s66_s13, %s66_s13 }
  0x12   :  { %27 = vst [vmem:[#allocation5] sm:$0xff] %v25_v4  ;;  %28 = vst [vmem:[#allocation5 + $0x8] sm:$0xff] %v26_v5  ;;  %p73_p8 = por %p72_p7, %p71_p6 }
  0x14   :  { %p74_p9 = pnand %p73_p8, %p67_p5 }
  0x16   :  { %77 = shalt.err (!%p74_p9)
}
  0x17   :  { %38 = dma.vmem_to_hbm [thread:$0]  %s36_s12, 256, %s109_s1, [#allocation4]  }
  0x18   :  { %88 = dma.done.wait [#allocation4], 256  }
  0x19   :  { %89 = vsyncadd [#allocation4], 4294967040 }
  0x1a   :  { %42 = vsyncpa [#allocation3], 1 }
  0x1b   :  { %43 = vsyncpa [#allocation4], 1 }

</bundles_post_ra>
